<compile_context>
chip_gen: v7x
topology: tpu7x:2x2x1
jax: 0.10.0
libtpu: 0.0.40
codegen_flags: <defaults>
</compile_context>

<pallas_src>
import functools

import jax
import jax.numpy as jnp
from jax.experimental import pallas as pl
from jax.experimental.pallas import tpu as pltpu

# ---- model hyperparameters (small, consistent with the module) ----
DIM = 32          # embedding dim
HEADS = 2         # number of heads
DIM_HEAD = 16     # per-head dim
INNER = HEADS * DIM_HEAD   # 32
BATCH = 2
SEQ = 8
LN_EPS = 1e-5     # nn.LayerNorm default
SCALE = DIM_HEAD ** -0.5
# dropout = 0.0 -> identity in the forward pass; nothing to implement.


def _attention_kernel(x_ref, gamma_ref, beta_ref, wq_ref, wk_ref, wv_ref,
                      wo_ref, bo_ref, o_ref, *, batch, seq, heads, eps):
    """Whole batch in one invocation.

    x_ref:     (B*N, D)      input tokens (flattened batch*tokens)
    gamma_ref: (1, D)        LayerNorm weight
    beta_ref:  (1, D)        LayerNorm bias
    wq_ref:    (B*H, dh, D)  per-(batch,head) Q weight, softmax scale folded in
    wk_ref:    (B*H, dh, D)  per-(batch,head) K weight
    wv_ref:    (B*H, dh, D)  per-(batch,head) V weight
    wo_ref:    (B*H, dh, D)  per-(batch,head) slice of the to_out weight
    bo_ref:    (1, D)        to_out bias
    o_ref:     (B*N, D)      output (flattened batch*tokens)
    """
    x = x_ref[...]                                        # (B*N, D) f32
    dim = x.shape[-1]

    # ---- LayerNorm over the feature dim, on the whole token slab at once ----
    mean = jnp.mean(x, axis=-1, keepdims=True)
    xc = x - mean
    var = jnp.mean(xc * xc, axis=-1, keepdims=True)
    xn = xc * jax.lax.rsqrt(var + eps) * gamma_ref[...] + beta_ref[...]

    # ---- replicate tokens per (batch, head): g = b*heads + h ----
    # (leading-dim reshape/broadcast only; the (sublane, lane) layout of each
    #  (N, D) slab is untouched -> no relayout)
    xg = jnp.broadcast_to(
        xn.reshape(batch, 1, seq, dim), (batch, heads, seq, dim)
    ).reshape(batch * heads, seq, dim)                    # (G, N, D)

    # ---- QKV projections: batched matmuls (single MXU stream each) ----
    q = jnp.einsum('gnd,gcd->gnc', xg, wq_ref[...],
                   preferred_element_type=jnp.float32)    # (G, N, dh), pre-scaled
    k = jnp.einsum('gnd,gcd->gnc', xg, wk_ref[...],
                   preferred_element_type=jnp.float32)
    v = jnp.einsum('gnd,gcd->gnc', xg, wv_ref[...],
                   preferred_element_type=jnp.float32)

    # ---- scaled dot-product attention, heads batched on g (no k.T) ----
    s = jnp.einsum('gnc,gmc->gnm', q, k,
                   preferred_element_type=jnp.float32)    # (G, N, N)
    m = jnp.max(s, axis=-1, keepdims=True)
    e = jnp.exp(s - m)
    attn = e * pl.reciprocal(jnp.sum(e, axis=-1, keepdims=True), approx=True)
    o = jnp.einsum('gnm,gmc->gnc', attn, v,
                   preferred_element_type=jnp.float32)    # (G, N, dh)

    # ---- output projection folded per head, then summed over heads ----
    yg = jnp.einsum('gnc,gcd->gnd', o, wo_ref[...],
                    preferred_element_type=jnp.float32)   # (G, N, D)
    y = yg.reshape(batch, heads, seq, dim).sum(axis=1)    # (B, N, D)
    y = y.reshape(batch * seq, dim) + bo_ref[...]         # (B*N, D)
    o_ref[...] = y.astype(o_ref.dtype)


def attention_forward(x, gamma, beta, w_qkv, w_out, b_out):
    B, N, D = x.shape
    H, dh = HEADS, DIM_HEAD
    I = H * dh
    G = B * H

    # --- one-time weight re-layout in the wrapper (outside the kernel) ---
    def per_head(w):                       # (D, I) -> (H, dh, D)
        return w.reshape(D, H, dh).transpose(1, 2, 0)

    w_q = per_head(w_qkv[:, 0 * I:1 * I]) * SCALE   # fold softmax scale into Q
    w_k = per_head(w_qkv[:, 1 * I:2 * I])
    w_v = per_head(w_qkv[:, 2 * I:3 * I])
    w_o = w_out.reshape(H, dh, D)                   # (H, dh, D)

    def rep(w):                            # (H, dh, D) -> (B*H, dh, D), g = b*H + h
        return jnp.broadcast_to(w[None], (B, H, dh, D)).reshape(G, dh, D)

    x2 = x.reshape(B * N, D)

    kernel = functools.partial(_attention_kernel, batch=B, seq=N, heads=H,
                               eps=LN_EPS)
    y2 = pl.pallas_call(
        kernel,
        out_shape=jax.ShapeDtypeStruct((B * N, D), x.dtype),
        grid_spec=pltpu.PrefetchScalarGridSpec(
            num_scalar_prefetch=0,
            grid=(1,),                      # single step: whole problem in VMEM
            in_specs=[
                pl.BlockSpec((B * N, D), lambda i: (0, 0)),
                pl.BlockSpec((1, D), lambda i: (0, 0)),
                pl.BlockSpec((1, D), lambda i: (0, 0)),
                pl.BlockSpec((G, dh, D), lambda i: (0, 0, 0)),
                pl.BlockSpec((G, dh, D), lambda i: (0, 0, 0)),
                pl.BlockSpec((G, dh, D), lambda i: (0, 0, 0)),
                pl.BlockSpec((G, dh, D), lambda i: (0, 0, 0)),
                pl.BlockSpec((1, D), lambda i: (0, 0)),
            ],
            out_specs=pl.BlockSpec((B * N, D), lambda i: (0, 0)),
        ),
        compiler_params=pltpu.CompilerParams(
            dimension_semantics=("arbitrary",)),
    )(x2, gamma, beta, rep(w_q), rep(w_k), rep(w_v), rep(w_o), b_out)
    return y2.reshape(B, N, D)


def reference_forward(x, gamma, beta, w_qkv, w_out, b_out):
    """Pure-JAX reference mirroring the PyTorch module."""
    mean = jnp.mean(x, axis=-1, keepdims=True)
    var = jnp.mean((x - mean) ** 2, axis=-1, keepdims=True)
    xn = (x - mean) / jnp.sqrt(var + LN_EPS) * gamma[0] + beta[0]
    qkv = xn @ w_qkv                                   # (B, N, 3I)
    q, k, v = jnp.split(qkv, 3, axis=-1)
    def split_heads(t):                                # b n (h d) -> b h n d
        B, N, _ = t.shape
        return t.reshape(B, N, HEADS, DIM_HEAD).transpose(0, 2, 1, 3)
    q, k, v = map(split_heads, (q, k, v))
    dots = jnp.einsum('bhnd,bhmd->bhnm', q, k) * SCALE
    attn = jax.nn.softmax(dots, axis=-1)
    out = jnp.einsum('bhnm,bhmd->bhnd', attn, v)
    out = out.transpose(0, 2, 1, 3).reshape(x.shape[0], x.shape[1], INNER)
    return out @ w_out + b_out[0]


if __name__ == "__main__":
    key = jax.random.PRNGKey(0)
    kx, kg, kb, kqkv, kwo, kbo = jax.random.split(key, 6)

    x = jax.random.normal(kx, (BATCH, SEQ, DIM), dtype=jnp.float32)

    # Deterministic synthetic parameters (shapes from the module __init__).
    gamma = 1.0 + 0.02 * jax.random.normal(kg, (1, DIM), dtype=jnp.float32)
    beta = 0.02 * jax.random.normal(kb, (1, DIM), dtype=jnp.float32)
    w_qkv = 0.1 * jax.random.normal(kqkv, (DIM, 3 * INNER), dtype=jnp.float32)
    w_out = 0.1 * jax.random.normal(kwo, (INNER, DIM), dtype=jnp.float32)
    b_out = 0.02 * jax.random.normal(kbo, (1, DIM), dtype=jnp.float32)

    y = attention_forward(x, gamma, beta, w_qkv, w_out, b_out)
    y = jax.block_until_ready(y)

    y_ref = reference_forward(x, gamma, beta, w_qkv, w_out, b_out)
    # Tolerance covers the EUP approx reciprocal in the softmax (~1e-4 relative);
    # any structural error would be orders of magnitude larger.
    assert jnp.allclose(y, y_ref, atol=1e-3, rtol=1e-3), "mismatch vs reference"

    print("KERNEL_OK")
</pallas_src>

<mosaic_0001>
module attributes {stable_mosaic.version = 11 : i64} {
  func.func @_attention_kernel(%arg0: i32, %arg1: memref<16x32xf32, #tpu.memory_space<vmem>>, %arg2: memref<1x32xf32, #tpu.memory_space<vmem>>, %arg3: memref<1x32xf32, #tpu.memory_space<vmem>>, %arg4: memref<4x16x32xf32, #tpu.memory_space<vmem>>, %arg5: memref<4x16x32xf32, #tpu.memory_space<vmem>>, %arg6: memref<4x16x32xf32, #tpu.memory_space<vmem>>, %arg7: memref<4x16x32xf32, #tpu.memory_space<vmem>>, %arg8: memref<1x32xf32, #tpu.memory_space<vmem>>, %arg9: memref<16x32xf32, #tpu.memory_space<vmem>>) attributes {dimension_semantics = [#tpu.dimension_semantics<arbitrary>], iteration_bounds = array<i64: 1>, scalar_prefetch = 0 : i64, scratch_operands = 0 : i64, tpu.core_type = #tpu.core_type<tc>, window_params = [{pipeline_mode = #tpu.pipeline_mode<synchronous>, transform_indices = @transform_0, window_bounds = array<i64: 16, 32>}, {pipeline_mode = #tpu.pipeline_mode<synchronous>, transform_indices = @transform_1, window_bounds = array<i64: 1, 32>}, {pipeline_mode = #tpu.pipeline_mode<synchronous>, transform_indices = @transform_2, window_bounds = array<i64: 1, 32>}, {pipeline_mode = #tpu.pipeline_mode<synchronous>, transform_indices = @transform_3, window_bounds = array<i64: 4, 16, 32>}, {pipeline_mode = #tpu.pipeline_mode<synchronous>, transform_indices = @transform_4, window_bounds = array<i64: 4, 16, 32>}, {pipeline_mode = #tpu.pipeline_mode<synchronous>, transform_indices = @transform_5, window_bounds = array<i64: 4, 16, 32>}, {pipeline_mode = #tpu.pipeline_mode<synchronous>, transform_indices = @transform_6, window_bounds = array<i64: 4, 16, 32>}, {pipeline_mode = #tpu.pipeline_mode<synchronous>, transform_indices = @transform_7, window_bounds = array<i64: 1, 32>}, {pipeline_mode = #tpu.pipeline_mode<synchronous>, transform_indices = @transform_8, window_bounds = array<i64: 16, 32>}]} {
    %c0 = arith.constant 0 : index
    %c0_0 = arith.constant 0 : index
    %0 = vector.load %arg1[%c0, %c0_0] : memref<16x32xf32, #tpu.memory_space<vmem>>, vector<16x32xf32>
    %cst = arith.constant dense<0.000000e+00> : vector<16xf32>
    %1 = vector.multi_reduction <add>, %0, %cst [1] : vector<16x32xf32> to vector<16xf32>
    %2 = vector.shape_cast %1 : vector<16xf32> to vector<16x1xf32>
    %cst_1 = arith.constant 3.200000e+01 : f32
    %3 = vector.broadcast %cst_1 : f32 to vector<16x1xf32>
    %4 = arith.divf %2, %3 : vector<16x1xf32>
    %5 = vector.broadcast %4 : vector<16x1xf32> to vector<16x32xf32>
    %6 = arith.subf %0, %5 : vector<16x32xf32>
    %7 = arith.mulf %6, %6 : vector<16x32xf32>
    %cst_2 = arith.constant dense<0.000000e+00> : vector<16xf32>
    %8 = vector.multi_reduction <add>, %7, %cst_2 [1] : vector<16x32xf32> to vector<16xf32>
    %9 = vector.shape_cast %8 : vector<16xf32> to vector<16x1xf32>
    %cst_3 = arith.constant 3.200000e+01 : f32
    %10 = vector.broadcast %cst_3 : f32 to vector<16x1xf32>
    %11 = arith.divf %9, %10 : vector<16x1xf32>
    %cst_4 = arith.constant 9.99999974E-6 : f32
    %12 = vector.broadcast %cst_4 : f32 to vector<16x1xf32>
    %13 = arith.addf %11, %12 : vector<16x1xf32>
    %14 = math.rsqrt %13 : vector<16x1xf32>
    %15 = vector.broadcast %14 : vector<16x1xf32> to vector<16x32xf32>
    %16 = arith.mulf %6, %15 : vector<16x32xf32>
    %c0_5 = arith.constant 0 : index
    %c0_6 = arith.constant 0 : index
    %17 = vector.load %arg2[%c0_5, %c0_6] : memref<1x32xf32, #tpu.memory_space<vmem>>, vector<1x32xf32>
    %18 = vector.broadcast %17 : vector<1x32xf32> to vector<16x32xf32>
    %19 = arith.mulf %16, %18 : vector<16x32xf32>
    %c0_7 = arith.constant 0 : index
    %c0_8 = arith.constant 0 : index
    %20 = vector.load %arg3[%c0_7, %c0_8] : memref<1x32xf32, #tpu.memory_space<vmem>>, vector<1x32xf32>
    %21 = vector.broadcast %20 : vector<1x32xf32> to vector<16x32xf32>
    %22 = arith.addf %19, %21 : vector<16x32xf32>
    %23 = vector.shape_cast %22 : vector<16x32xf32> to vector<2x1x8x32xf32>
    %24 = vector.shape_cast %23 : vector<2x1x8x32xf32> to vector<2x1x8x32xf32>
    %25 = vector.broadcast %24 : vector<2x1x8x32xf32> to vector<2x2x8x32xf32>
    %26 = vector.shape_cast %25 : vector<2x2x8x32xf32> to vector<4x8x32xf32>
    %c0_9 = arith.constant 0 : index
    %c0_10 = arith.constant 0 : index
    %c0_11 = arith.constant 0 : index
    %27 = vector.load %arg4[%c0_9, %c0_10, %c0_11] : memref<4x16x32xf32, #tpu.memory_space<vmem>>, vector<4x16x32xf32>
    "tpu.trace_start"() <{level = 10 : i32, message = "gnd,gcd->gnc"}> : () -> ()
    %cst_12 = arith.constant dense<0.000000e+00> : vector<4x8x16xf32>
    %28 = tpu.matmul %26, %27, %cst_12 {dimension_numbers = #tpu.dot_dimension_numbers<[2], [2], [1], [1], [0, 0, 0, 1, 1, 1], [0], [0]>} : vector<4x8x32xf32>, vector<4x16x32xf32>, vector<4x8x16xf32> -> vector<4x8x16xf32>
    "tpu.trace_stop"() : () -> ()
    %c0_13 = arith.constant 0 : index
    %c0_14 = arith.constant 0 : index
    %c0_15 = arith.constant 0 : index
    %29 = vector.load %arg5[%c0_13, %c0_14, %c0_15] : memref<4x16x32xf32, #tpu.memory_space<vmem>>, vector<4x16x32xf32>
    "tpu.trace_start"() <{level = 10 : i32, message = "gnd,gcd->gnc"}> : () -> ()
    %cst_16 = arith.constant dense<0.000000e+00> : vector<4x8x16xf32>
    %30 = tpu.matmul %26, %29, %cst_16 {dimension_numbers = #tpu.dot_dimension_numbers<[2], [2], [1], [1], [0, 0, 0, 1, 1, 1], [0], [0]>} : vector<4x8x32xf32>, vector<4x16x32xf32>, vector<4x8x16xf32> -> vector<4x8x16xf32>
    "tpu.trace_stop"() : () -> ()
    %c0_17 = arith.constant 0 : index
    %c0_18 = arith.constant 0 : index
    %c0_19 = arith.constant 0 : index
    %31 = vector.load %arg6[%c0_17, %c0_18, %c0_19] : memref<4x16x32xf32, #tpu.memory_space<vmem>>, vector<4x16x32xf32>
    "tpu.trace_start"() <{level = 10 : i32, message = "gnd,gcd->gnc"}> : () -> ()
    %cst_20 = arith.constant dense<0.000000e+00> : vector<4x8x16xf32>
    %32 = tpu.matmul %26, %31, %cst_20 {dimension_numbers = #tpu.dot_dimension_numbers<[2], [2], [1], [1], [0, 0, 0, 1, 1, 1], [0], [0]>} : vector<4x8x32xf32>, vector<4x16x32xf32>, vector<4x8x16xf32> -> vector<4x8x16xf32>
    "tpu.trace_stop"() : () -> ()
    "tpu.trace_start"() <{level = 10 : i32, message = "gnc,gmc->gnm"}> : () -> ()
    %cst_21 = arith.constant dense<0.000000e+00> : vector<4x8x8xf32>
    %33 = tpu.matmul %28, %30, %cst_21 {dimension_numbers = #tpu.dot_dimension_numbers<[2], [2], [1], [1], [0, 0, 0, 1, 1, 1], [0], [0]>} : vector<4x8x16xf32>, vector<4x8x16xf32>, vector<4x8x8xf32> -> vector<4x8x8xf32>
    "tpu.trace_stop"() : () -> ()
    %cst_22 = arith.constant dense<0xFF800000> : vector<4x8xf32>
    %34 = vector.multi_reduction <maximumf>, %33, %cst_22 [2] : vector<4x8x8xf32> to vector<4x8xf32>
    %35 = vector.shape_cast %34 : vector<4x8xf32> to vector<4x8x1xf32>
    %36 = vector.broadcast %35 : vector<4x8x1xf32> to vector<4x8x8xf32>
    %37 = arith.subf %33, %36 : vector<4x8x8xf32>
    %38 = math.exp %37 : vector<4x8x8xf32>
    %cst_23 = arith.constant dense<0.000000e+00> : vector<4x8xf32>
    %39 = vector.multi_reduction <add>, %38, %cst_23 [2] : vector<4x8x8xf32> to vector<4x8xf32>
    %40 = vector.shape_cast %39 : vector<4x8xf32> to vector<4x8x1xf32>
    %41 = tpu.reciprocal %40 {approx = true} : vector<4x8x1xf32> -> vector<4x8x1xf32>
    %42 = vector.broadcast %41 : vector<4x8x1xf32> to vector<4x8x8xf32>
    %43 = arith.mulf %38, %42 : vector<4x8x8xf32>
    "tpu.trace_start"() <{level = 10 : i32, message = "gnm,gmc->gnc"}> : () -> ()
    %cst_24 = arith.constant dense<0.000000e+00> : vector<4x8x16xf32>
    %44 = tpu.matmul %43, %32, %cst_24 {dimension_numbers = #tpu.dot_dimension_numbers<[2], [1], [1], [2], [0, 0, 0, 1, 1, 2], [0], [0]>} : vector<4x8x8xf32>, vector<4x8x16xf32>, vector<4x8x16xf32> -> vector<4x8x16xf32>
    "tpu.trace_stop"() : () -> ()
    %c0_25 = arith.constant 0 : index
    %c0_26 = arith.constant 0 : index
    %c0_27 = arith.constant 0 : index
    %45 = vector.load %arg7[%c0_25, %c0_26, %c0_27] : memref<4x16x32xf32, #tpu.memory_space<vmem>>, vector<4x16x32xf32>
    "tpu.trace_start"() <{level = 10 : i32, message = "gnc,gcd->gnd"}> : () -> ()
    %cst_28 = arith.constant dense<0.000000e+00> : vector<4x8x32xf32>
    %46 = tpu.matmul %44, %45, %cst_28 {dimension_numbers = #tpu.dot_dimension_numbers<[2], [1], [1], [2], [0, 0, 0, 1, 1, 2], [0], [0]>} : vector<4x8x16xf32>, vector<4x16x32xf32>, vector<4x8x32xf32> -> vector<4x8x32xf32>
    "tpu.trace_stop"() : () -> ()
    %47 = vector.shape_cast %46 : vector<4x8x32xf32> to vector<2x2x8x32xf32>
    %cst_29 = arith.constant dense<0.000000e+00> : vector<2x8x32xf32>
    %48 = vector.multi_reduction <add>, %47, %cst_29 [1] : vector<2x2x8x32xf32> to vector<2x8x32xf32>
    %49 = vector.shape_cast %48 : vector<2x8x32xf32> to vector<16x32xf32>
    %c0_30 = arith.constant 0 : index
    %c0_31 = arith.constant 0 : index
    %50 = vector.load %arg8[%c0_30, %c0_31] : memref<1x32xf32, #tpu.memory_space<vmem>>, vector<1x32xf32>
    %51 = vector.broadcast %50 : vector<1x32xf32> to vector<16x32xf32>
    %52 = arith.addf %49, %51 : vector<16x32xf32>
    %c0_32 = arith.constant 0 : index
    %c0_33 = arith.constant 0 : index
    %53 = vector.load %arg9[%c0_32, %c0_33] : memref<16x32xf32, #tpu.memory_space<vmem>>, vector<16x32xf32>
    tpu.vector_store %arg9[%c0_32, %c0_33], %52 {strides = array<i32>} : memref<16x32xf32, #tpu.memory_space<vmem>>, vector<16x32xf32>,
    return
  }
  func.func @transform_0(%arg0: i32) -> (i32, i32) {
    %c0_i32 = arith.constant 0 : i32
    %c0_i32_0 = arith.constant 0 : i32
    %c0_i32_1 = arith.constant 0 : i32
    return %c0_i32, %c0_i32_0 : i32, i32
  }
  func.func @transform_1(%arg0: i32) -> (i32, i32) {
    %c0_i32 = arith.constant 0 : i32
    %c0_i32_0 = arith.constant 0 : i32
    %c0_i32_1 = arith.constant 0 : i32
    return %c0_i32, %c0_i32_0 : i32, i32
  }
  func.func @transform_2(%arg0: i32) -> (i32, i32) {
    %c0_i32 = arith.constant 0 : i32
    %c0_i32_0 = arith.constant 0 : i32
    %c0_i32_1 = arith.constant 0 : i32
    return %c0_i32, %c0_i32_0 : i32, i32
  }
  func.func @transform_3(%arg0: i32) -> (i32, i32, i32) {
    %c0_i32 = arith.constant 0 : i32
    %c0_i32_0 = arith.constant 0 : i32
    %c0_i32_1 = arith.constant 0 : i32
    %c0_i32_2 = arith.constant 0 : i32
    return %c0_i32, %c0_i32_0, %c0_i32_1 : i32, i32, i32
  }
  func.func @transform_4(%arg0: i32) -> (i32, i32, i32) {
    %c0_i32 = arith.constant 0 : i32
    %c0_i32_0 = arith.constant 0 : i32
    %c0_i32_1 = arith.constant 0 : i32
    %c0_i32_2 = arith.constant 0 : i32
    return %c0_i32, %c0_i32_0, %c0_i32_1 : i32, i32, i32
  }
  func.func @transform_5(%arg0: i32) -> (i32, i32, i32) {
    %c0_i32 = arith.constant 0 : i32
    %c0_i32_0 = arith.constant 0 : i32
    %c0_i32_1 = arith.constant 0 : i32
    %c0_i32_2 = arith.constant 0 : i32
    return %c0_i32, %c0_i32_0, %c0_i32_1 : i32, i32, i32
  }
  func.func @transform_6(%arg0: i32) -> (i32, i32, i32) {
    %c0_i32 = arith.constant 0 : i32
    %c0_i32_0 = arith.constant 0 : i32
    %c0_i32_1 = arith.constant 0 : i32
    %c0_i32_2 = arith.constant 0 : i32
    return %c0_i32, %c0_i32_0, %c0_i32_1 : i32, i32, i32
  }
  func.func @transform_7(%arg0: i32) -> (i32, i32) {
    %c0_i32 = arith.constant 0 : i32
    %c0_i32_0 = arith.constant 0 : i32
    %c0_i32_1 = arith.constant 0 : i32
    return %c0_i32, %c0_i32_0 : i32, i32
  }
  func.func @transform_8(%arg0: i32) -> (i32, i32) {
    %c0_i32 = arith.constant 0 : i32
    %c0_i32_0 = arith.constant 0 : i32
    %c0_i32_1 = arith.constant 0 : i32
    return %c0_i32, %c0_i32_0 : i32, i32
  }
}

</mosaic_0001>

<bundles_post_ra>
// kernel: tpu_custom_call.1
= control target key start
LH: loop header
LB: loop body
LE: loop exit
PB: predicated region body
PF: predicated region fallthrough
CT: control target
= control target key end

     0   :  { %13 = vsyncpa [#allocation3], 0  ;;  %s2888_s0 = inlined_call_operand.hbm [shape: f32[16,32], index: 0, kind: input, shape index: {}]   ;;  %s2889_s1 = inlined_call_operand.vmem [shape: f32[1,32], index: 1, kind: input, shape index: {}]   ;;  %s2890_s2 = inlined_call_operand.vmem [shape: f32[1,32], index: 2, kind: input, shape index: {}]   ;;  %s2891_s3 = inlined_call_operand.hbm [shape: f32[4,16,32], index: 3, kind: input, shape index: {}]   ;;  %s2892_s4 = inlined_call_operand.hbm [shape: f32[4,16,32], index: 4, kind: input, shape index: {}]   ;;  %s2893_s5 = inlined_call_operand.hbm [shape: f32[4,16,32], index: 5, kind: input, shape index: {}]   ;;  %s2894_s6 = inlined_call_operand.hbm [shape: f32[4,16,32], index: 6, kind: input, shape index: {}]   ;;  %s2895_s7 = inlined_call_operand.vmem [shape: f32[1,32], index: 7, kind: input, shape index: {}]   ;;  %s2896_s8 = inlined_call_operand.hbm [shape: f32[16,32], index: 8, kind: output, shape index: {}]  }
   0x1   :  { %14 = vsyncpa [#allocation6], 0 }
   0x2   :  { %15 = vsyncpa [#allocation9], 0 }
   0x3   :  { %16 = vsyncpa [#allocation4], 0  ;;  %s2568_s27 = smov [#allocation5]   ;;  %s2569_s29 = smov [#allocation8]  }
   0x4   :  { %s38_s28 = sshll.u32 %s2568_s27, 4  ;;  %s62_s30 = sshll.u32 %s2569_s29, 4  ;;  %s39_s28 = int_to_ptr.vmem [resolvable:$true] %s38_s28  ;;  %s2624_s30 = int_to_ptr.vmem [resolvable:$true] %s62_s30 }
   0x5   :  { %s2428_s11 = scalar_lea.hbm %s2891_s3, 1024 }
   0x6   :  { %p2429_p0 = scmp.ne.s32.totalorder %s2891_s3, %s2428_s11  ;;  %p2432_p1 = scmp.lt.u32.totalorder %s2428_s11, %s2891_s3 }
   0x8   :  { %p2434_p2 = pnand %p2432_p1, %p2429_p0 }
   0xa   :  { %2437 = shalt.err (!%p2434_p2)
}
   0xb   :  { %s2438_s16 = scalar_lea.vmem %s39_s28, 1024  ;;  %p2443_p4 = scmp.lt.s32.totalorder %s39_s28, %s39_s28 }
   0xc   :  { %p2439_p3 = scmp.ne.s32.totalorder %s39_s28, %s2438_s16  ;;  %p2444_p5 = scmp.lt.s32.totalorder %s2438_s16, %s2438_s16 }
   0xe   :  { %p2445_p6 = por %p2444_p5, %p2443_p4 }
  0x10   :  { %p2446_p7 = pnand %p2445_p6, %p2439_p3 }
  0x12   :  { %2449 = shalt.err (!%p2446_p7)
}
  0x13   :  { %s2570_s17 = smov 128   ;;  %s2571_s18 = smov 8  }
  0x14   :  { %44 = dma.hbm_to_vmem [thread:$0]  %s2891_s3, 1024, %s39_s28, [#allocation6], %s2570_s17, %s2570_s17, %s2571_s18  }
  0x15   :  { %s2450_s23 = scalar_lea.hbm %s2893_s5, 1024 }
  0x16   :  { %p2451_p8 = scmp.ne.s32.totalorder %s2893_s5, %s2450_s23  ;;  %p2454_p9 = scmp.lt.u32.totalorder %s2450_s23, %s2893_s5 }
  0x18   :  { %p2456_p10 = pnand %p2454_p9, %p2451_p8 }
  0x1a   :  { %2459 = shalt.err (!%p2456_p10)
}
  0x1b   :  { %s2460_s29 = scalar_lea.vmem %s2624_s30, 1024  ;;  %p2465_p12 = scmp.lt.s32.totalorder %s2624_s30, %s2624_s30 }
  0x1c   :  { %p2461_p11 = scmp.ne.s32.totalorder %s2624_s30, %s2460_s29  ;;  %p2466_p13 = scmp.lt.s32.totalorder %s2460_s29, %s2460_s29 }
  0x1e   :  { %p2467_p0 = por %p2466_p13, %p2465_p12 }
  0x20   :  { %p2468_p1 = pnand %p2467_p0, %p2461_p11 }
  0x22   :  { %2471 = shalt.err (!%p2468_p1)
}
  0x23   :  { %68 = dma.hbm_to_vmem [thread:$0]  %s2893_s5, 1024, %s2624_s30, [#allocation9], %s2570_s17, %s2570_s17, %s2571_s18  }
  0x24   :  { %s2572_s9 = smov [#allocation2]   ;;  %s2573_s11 = smov [#allocation7]  }
  0x25   :  { %s22_s10 = sshll.u32 %s2572_s9, 4  ;;  %s50_s12 = sshll.u32 %s2573_s11, 4  ;;  %s23_s10 = int_to_ptr.vmem [resolvable:$true] %s22_s10  ;;  %s2661_s12 = int_to_ptr.vmem [resolvable:$true] %s50_s12 }
  0x26   :  { %s2472_s15 = scalar_lea.hbm %s2888_s0, 256 }
  0x27   :  { %p2473_p2 = scmp.ne.s32.totalorder %s2888_s0, %s2472_s15  ;;  %p2476_p3 = scmp.lt.u32.totalorder %s2472_s15, %s2888_s0 }
  0x29   :  { %p2478_p4 = pnand %p2476_p3, %p2473_p2 }
  0x2b   :  { %2481 = shalt.err (!%p2478_p4)
}
  0x2c   :  { %s2482_s5 = scalar_lea.vmem %s23_s10, 256  ;;  %p2487_p6 = scmp.lt.s32.totalorder %s23_s10, %s23_s10 }
  0x2d   :  { %p2483_p5 = scmp.ne.s32.totalorder %s23_s10, %s2482_s5  ;;  %p2488_p7 = scmp.lt.s32.totalorder %s2482_s5, %s2482_s5 }
  0x2f   :  { %p2489_p8 = por %p2488_p7, %p2487_p6 }
  0x31   :  { %p2490_p9 = pnand %p2489_p8, %p2483_p5 }
  0x33   :  { %2493 = shalt.err (!%p2490_p9)
}
  0x34   :  { %28 = dma.hbm_to_vmem [thread:$0]  %s2888_s0, 256, %s23_s10, [#allocation3], %s2570_s17, %s2570_s17, %s2571_s18  }
  0x35   :  { %s2494_s25 = scalar_lea.hbm %s2892_s4, 1024 }
  0x36   :  { %p2495_p10 = scmp.ne.s32.totalorder %s2892_s4, %s2494_s25  ;;  %p2498_p11 = scmp.lt.u32.totalorder %s2494_s25, %s2892_s4 }
  0x38   :  { %p2500_p12 = pnand %p2498_p11, %p2495_p10 }
  0x3a   :  { %2503 = shalt.err (!%p2500_p12)
}
  0x3b   :  { %s2504_s28 = scalar_lea.vmem %s2661_s12, 1024  ;;  %p2509_p0 = scmp.lt.s32.totalorder %s2661_s12, %s2661_s12 }
  0x3c   :  { %p2505_p13 = scmp.ne.s32.totalorder %s2661_s12, %s2504_s28  ;;  %p2510_p1 = scmp.lt.s32.totalorder %s2504_s28, %s2504_s28 }
  0x3e   :  { %p2511_p2 = por %p2510_p1, %p2509_p0 }
  0x40   :  { %p2512_p3 = pnand %p2511_p2, %p2505_p13 }
  0x42   :  { %2515 = shalt.err (!%p2512_p3)
}
  0x43   :  { %56 = dma.hbm_to_vmem [thread:$0]  %s2892_s4, 1024, %s2661_s12, [#allocation6], %s2570_s17, %s2570_s17, %s2571_s18  }
  0x44   :  { %s2574_s10 = smov [#allocation10]   ;;  %s2516_s15 = scalar_lea.hbm %s2894_s6, 1024 }
  0x45   :  { %s74_s11 = sshll.u32 %s2574_s10, 4  ;;  %p2517_p4 = scmp.ne.s32.totalorder %s2894_s6, %s2516_s15  ;;  %s75_s11 = int_to_ptr.vmem [resolvable:$true] %s74_s11 }
  0x46   :  { %p2520_p5 = scmp.lt.u32.totalorder %s2516_s15, %s2894_s6 }
  0x48   :  { %p2522_p6 = pnand %p2520_p5, %p2517_p4 }
  0x4a   :  { %2525 = shalt.err (!%p2522_p6)
}
  0x4b   :  { %s2526_s5 = scalar_lea.vmem %s75_s11, 1024  ;;  %p2531_p8 = scmp.lt.s32.totalorder %s75_s11, %s75_s11 }
  0x4c   :  { %p2527_p7 = scmp.ne.s32.totalorder %s75_s11, %s2526_s5  ;;  %p2532_p9 = scmp.lt.s32.totalorder %s2526_s5, %s2526_s5 }
  0x4e   :  { %p2533_p10 = por %p2532_p9, %p2531_p8 }
  0x50   :  { %p2534_p11 = pnand %p2533_p10, %p2527_p7 }
  0x52   :  { %2537 = shalt.err (!%p2534_p11)
}
  0x53   :  { %80 = dma.hbm_to_vmem [thread:$0]  %s2894_s6, 1024, %s75_s11, [#allocation9], %s2570_s17, %s2570_s17, %s2571_s18  }
  0x54   :  { %2560 = dma.done.wait [#allocation3], 256  }
  0x55   :  { %2561 = vsyncadd [#allocation3], 4294967040 }
  0x56   :  { %2562 = dma.done.wait [#allocation6], 2048  }
  0x57   :  { %2563 = vsyncadd [#allocation6], 4294965248 }
  0x58   :  { %2564 = dma.done.wait [#allocation9], 2048  }
  0x59   :  { %2565 = vsyncadd [#allocation9], 4294965248  ;;  %vm100_vm0 = vcmask 261120   ;;  %v98_v0 = vld [vmem:[#allocation2] sm:$0xff]  ;;  %v99_v1 = vld [vmem:[#allocation2 + $0x8] sm:$0xff]  ;;  %v2575_v19 = vmov 0.0|0.0  }
  0x5a   :  { %v101_v2 = vsel %vm100_vm0, %v98_v0, 0.0  ;;  %v104_v3 = vsel %vm100_vm0, %v99_v1, 0.0  ;;  %v146_v14 = vld [vmem:[#allocation5] sm:$0xff]  ;;  %v147_v15 = vld [vmem:[#allocation5 + $0x8] sm:$0xff]  ;;  %v148_v16 = vld [vmem:[#allocation5 + $0x10] sm:$0xff]  ;;  %2337 = vmatprep.subr.bf16.mxu0 %v2575_v19  ;;  %2341 = vmatprep.subr.bf16.mxu1 %v2575_v19  ;;  %vm2576_vm2 = vmmov 0  }
  0x5b   :  { %102 = vadd.xlane.f32.xlu0 %v101_v2  ;;  %v2338_v17 = vpack.c.bf16 %v147_v15, %v146_v14  ;;  %v149_v18 = vld [vmem:[#allocation5 + $0x18] sm:$0xff]  ;;  %vm2721_vm1 = vmpackc.low %vm100_vm0, %vm100_vm0  ;;  %v2577_v22 = vmov 0.0   ;;  %v2066_v30 = vld [vmem:[%s2889_s1] ss:$0 sm:$0xff]  ;;  %vm1088_vm3 = vcmask 130048   ;;  %vm1393_vm4 = vcmask 64512  }
  0x5c   :  { %v2342_v21 = vpack.c.bf16 %v149_v18, %v148_v16  ;;  %2189 = vmatprep.mubr.msk.f32.mxu0 %vm2576_vm2, %v2577_v22  ;;  %2196 = vmatprep.mubr.msk.f32.mxu1 %vm2576_vm2, %v2577_v22  ;;  %v150_v31 = vld [vmem:[#allocation5 + $0x20] sm:$0xff]  ;;  %v151_v33 = vld [vmem:[#allocation5 + $0x28] sm:$0xff]  ;;  %v152_v34 = vld [vmem:[#allocation5 + $0x30] sm:$0xff]  ;;  %s2578_s24 = smov [#allocation11]  }
  0x5d   :  { %2340 = vmatpush3.bf16.xpose.msk.msra.mxu0 %vm2721_vm1, %v2338_v17  ;;  %v153_v35 = vld [vmem:[#allocation5 + $0x38] sm:$0xff]  ;;  %v2067_v36 = vld [vmem:[%s2890_s2] ss:$0 sm:$0xff]  ;;  %v2346_v39 = vpack.c.bf16 %v151_v33, %v150_v31  ;;  %v464_v43 = vld [vmem:[#allocation7] sm:$0xff]  ;;  %s2052_s25 = sshll.u32 %s2578_s24, 4  ;;  %s2053_s25 = int_to_ptr.vmem [resolvable:$true] %s2052_s25 }
  0x5e   :  { %2344 = vmatpush3.bf16.xpose.msk.msra.mxu1 %vm2721_vm1, %v2342_v21  ;;  %2345 = vmatprep.subr.bf16.mxu0 %v2575_v19  ;;  %v2350_v40 = vpack.c.bf16 %v153_v35, %v152_v34  ;;  %v465_v45 = vld [vmem:[#allocation7 + $0x8] sm:$0xff]  ;;  %v466_v46 = vld [vmem:[#allocation7 + $0x10] sm:$0xff]  ;;  %v467_v47 = vld [vmem:[#allocation7 + $0x18] sm:$0xff]  ;;  %p2543_p13 = scmp.lt.s32.totalorder %s2053_s25, %s2053_s25 }
  0x5f   :  { %105 = vadd.xlane.f32.xlu0 %v104_v3  ;;  %2349 = vmatprep.subr.bf16.mxu1 %v2575_v19  ;;  %v2354_v48 = vpack.c.bf16 %v465_v45, %v464_v43  ;;  %v2358_v49 = vpack.c.bf16 %v467_v47, %v466_v46  ;;  %v468_v51 = vld [vmem:[#allocation7 + $0x20] sm:$0xff]  ;;  %v469_v52 = vld [vmem:[#allocation7 + $0x28] sm:$0xff]  ;;  %v470_v53 = vld [vmem:[#allocation7 + $0x30] sm:$0xff] }
  0x60   :  { %v471_v54 = vld [vmem:[#allocation7 + $0x38] sm:$0xff]  ;;  %v2362_v55 = vpack.c.bf16 %v469_v52, %v468_v51  ;;  %v776_v57 = vld [vmem:[#allocation8] sm:$0xff]  ;;  %v777_v58 = vld [vmem:[#allocation8 + $0x8] sm:$0xff] }
  0x61   :  { %v2366_v56 = vpack.c.bf16 %v471_v54, %v470_v53  ;;  %v778_v59 = vld [vmem:[#allocation8 + $0x10] sm:$0xff]  ;;  %v779_v60 = vld [vmem:[#allocation8 + $0x18] sm:$0xff]  ;;  %v2370_v61 = vpack.c.bf16 %v777_v58, %v776_v57  ;;  %v780_v63 = vld [vmem:[#allocation8 + $0x20] sm:$0xff] }
  0x62   :  { %v2374_v62 = vpack.c.bf16 %v779_v60, %v778_v59  ;;  %v783_v2 = vld [vmem:[#allocation8 + $0x38] sm:$0xff] }
  0xe8   :  { %v103_v4 = vpop.xlane.xlu0 %102 }
  0xe9   :  { %v108_v5 = vmul.f32 0.03125, %v103_v4 }
  0xeb   :  { %v110_v6 = vsub.f32 %v98_v0, %v108_v5  ;;  %v781_v0 = vld [vmem:[#allocation8 + $0x28] sm:$0xff] }
  0xec   :  { %v106_v7 = vpop.xlane.xlu0 %105  ;;  %v2378_v3 = vpack.c.bf16 %v781_v0, %v780_v63 }
  0xed   :  { %v109_v8 = vmul.f32 0.03125, %v106_v7  ;;  %v112_v9 = vmul.f32 %v110_v6, %v110_v6 }
  0xef   :  { %v111_v10 = vsub.f32 %v99_v1, %v109_v8  ;;  %v114_v11 = vsel %vm100_vm0, %v112_v9, 0.0  ;;  %v782_v1 = vld [vmem:[#allocation8 + $0x30] sm:$0xff] }
  0xf0   :  { %115 = vadd.xlane.f32.xlu1 %v114_v11  ;;  %v2382_v4 = vpack.c.bf16 %v783_v2, %v782_v1 }
  0xf1   :  { %v113_v12 = vmul.f32 %v111_v10, %v111_v10 }
  0xf3   :  { %v117_v13 = vsel %vm100_vm0, %v113_v12, 0.0 }
  0xf4   :  { %118 = vadd.xlane.f32.xlu1 %v117_v13 }
 0x17d   :  { %v116_v23 = vpop.xlane.xlu1 %115 }
 0x17e   :  { %v120_v24 = vmul.f32 0.03125, %v116_v23 }
 0x180   :  { %v122_v25 = vadd.f32 1e-05, %v120_v24 }
 0x181   :  { %v119_v26 = vpop.xlane.xlu1 %118 }
 0x182   :  { %2408 = vrsqrt.f32 %v122_v25  ;;  %v121_v27 = vmul.f32 0.03125, %v119_v26 }
 0x184   :  { %v123_v28 = vadd.f32 1e-05, %v121_v27 }
 0x186   :  { %2410 = vrsqrt.f32 %v123_v28 }
 0x18c   :  { %v2409_v29 = vpop.eup %2408 }
 0x18d   :  { %v126_v32 = vmul.f32 %v2409_v29, %v110_v6 }
 0x18f   :  { %v135_v37 = vmul.f32 %v2066_v30, %v126_v32 }
 0x190   :  { %v2411_v38 = vpop.eup %2410 }
 0x191   :  { %v144_v41 = vadd.f32 %v2067_v36, %v135_v37  ;;  %v127_v42 = vmul.f32 %v2411_v38, %v111_v10 }
 0x193   :  { %2190 = vmatmul.mubr.msk.f32.vlgmr.msra.gmra.mrb[0].mxu0 %vm100_vm0, %v144_v41  ;;  %2197 = vmatmul.mubr.msk.f32.vlgmr.msra.gmra.mrb[0].mxu1 %vm100_vm0, %v144_v41  ;;  %v136_v44 = vmul.f32 %v2066_v30, %v127_v42 }
 0x194   :  { %2348 = vmatpush3.bf16.xpose.msk.msra.mxu0 %vm2721_vm1, %v2346_v39  ;;  %2352 = vmatpush3.bf16.xpose.msk.msra.mxu1 %vm2721_vm1, %v2350_v40 }
 0x195   :  { %2203 = vmatprep.mubr.msk.f32.mxu0 %vm2576_vm2, %v2577_v22  ;;  %2210 = vmatprep.mubr.msk.f32.mxu1 %vm2576_vm2, %v2577_v22  ;;  %v145_v50 = vadd.f32 %v2067_v36, %v136_v44 }
 0x196   :  { %2353 = vmatprep.subr.bf16.mxu0 %v2575_v19  ;;  %2357 = vmatprep.subr.bf16.mxu1 %v2575_v19 }
 0x19b   :  { %2204 = vmatmul.mubr.msk.f32.vlgmr.msra.gmra.mrb[2].mxu0 %vm100_vm0, %v145_v50  ;;  %2211 = vmatmul.mubr.msk.f32.vlgmr.msra.gmra.mrb[2].mxu1 %vm100_vm0, %v145_v50 }
 0x19c   :  { %2356 = vmatpush3.bf16.xpose.msk.msra.mxu0 %vm2721_vm1, %v2354_v48  ;;  %2360 = vmatpush3.bf16.xpose.msk.msra.mxu1 %vm2721_vm1, %v2358_v49 }
 0x19d   :  { %2217 = vmatprep.mubr.msk.f32.mxu0 %vm2576_vm2, %v2577_v22  ;;  %2224 = vmatprep.mubr.msk.f32.mxu1 %vm2576_vm2, %v2577_v22 }
 0x19e   :  { %2361 = vmatprep.subr.bf16.mxu0 %v2575_v19  ;;  %2365 = vmatprep.subr.bf16.mxu1 %v2575_v19 }
 0x1a3   :  { %2218 = vmatmul.mubr.msk.f32.vlgmr.msra.gmra.mrb[4].mxu0 %vm100_vm0, %v144_v41  ;;  %2225 = vmatmul.mubr.msk.f32.vlgmr.msra.gmra.mrb[4].mxu1 %vm100_vm0, %v144_v41 }
 0x1a4   :  { %2364 = vmatpush3.bf16.xpose.msk.msra.mxu0 %vm2721_vm1, %v2362_v55  ;;  %2368 = vmatpush3.bf16.xpose.msk.msra.mxu1 %vm2721_vm1, %v2366_v56 }
 0x1a5   :  { %2231 = vmatprep.mubr.msk.f32.mxu0 %vm2576_vm2, %v2577_v22  ;;  %2238 = vmatprep.mubr.msk.f32.mxu1 %vm2576_vm2, %v2577_v22 }
 0x1a6   :  { %2369 = vmatprep.subr.bf16.mxu0 %v2575_v19  ;;  %2373 = vmatprep.subr.bf16.mxu1 %v2575_v19 }
 0x1ab   :  { %2232 = vmatmul.mubr.msk.f32.vlgmr.msra.gmra.mrb[6].mxu0 %vm100_vm0, %v145_v50  ;;  %2239 = vmatmul.mubr.msk.f32.vlgmr.msra.gmra.mrb[6].mxu1 %vm100_vm0, %v145_v50 }
 0x1ac   :  { %2372 = vmatpush3.bf16.xpose.msk.msra.mxu0 %vm2721_vm1, %v2370_v61  ;;  %2376 = vmatpush3.bf16.xpose.msk.msra.mxu1 %vm2721_vm1, %v2374_v62 }
 0x1ad   :  { %2245 = vmatprep.mubr.msk.f32.mxu0 %vm2576_vm2, %v2577_v22  ;;  %2252 = vmatprep.mubr.msk.f32.mxu1 %vm2576_vm2, %v2577_v22 }
 0x1ae   :  { %2377 = vmatprep.subr.bf16.mxu0 %v2575_v19  ;;  %2381 = vmatprep.subr.bf16.mxu1 %v2575_v19 }
 0x1b3   :  { %2246 = vmatmul.mubr.msk.f32.vlgmr.msra.gmra.mrb[8].mxu0 %vm100_vm0, %v144_v41  ;;  %2253 = vmatmul.mubr.msk.f32.vlgmr.msra.gmra.mrb[8].mxu1 %vm100_vm0, %v144_v41 }
 0x1b4   :  { %2380 = vmatpush3.bf16.xpose.msk.msra.mxu0 %vm2721_vm1, %v2378_v3  ;;  %2384 = vmatpush3.bf16.xpose.msk.msra.mxu1 %vm2721_vm1, %v2382_v4 }
 0x1b5   :  { %2259 = vmatprep.mubr.msk.f32.mxu0 %vm2576_vm2, %v2577_v22  ;;  %2266 = vmatprep.mubr.msk.f32.mxu1 %vm2576_vm2, %v2577_v22 }
 0x1b6   :  { %2269 = vmatprep.subr.mxu0 %v2577_v22  ;;  %2274 = vmatprep.subr.mxu1 %v2577_v22 }
 0x1bb   :  { %2260 = vmatmul.mubr.msk.f32.vlgmr.msra.gmra.mrb[10].mxu0 %vm100_vm0, %v145_v50  ;;  %2267 = vmatmul.mubr.msk.f32.vlgmr.msra.gmra.mrb[10].mxu1 %vm100_vm0, %v145_v50 }
 0x1bc   :  { %2271 = vmatprep.mubr.msk.f32.mxu0 %vm2576_vm2, %v2577_v22  ;;  %2276 = vmatprep.mubr.msk.f32.mxu1 %vm2576_vm2, %v2577_v22 }
 0x266   :  { %v229_v5 = vpop.f32.mrb[0].mxu0  ;;  %v305_v6 = vpop.f32.mrb[0].mxu1 }
 0x267   :  { %v2191_v7 = vpop.f32.mrb[1].mxu0  ;;  %v2198_v8 = vpop.f32.mrb[1].mxu1 }
 0x268   :  { %v1732_v7 = vld [vmem:[#allocation10 + $0x10] sm:$0xff]  ;;  %v1733_v8 = vld [vmem:[#allocation10 + $0x18] sm:$0xff] }
 0x26e   :  { %v384_v9 = vpop.f32.mrb[2].mxu0  ;;  %v460_v10 = vpop.f32.mrb[2].mxu1 }
 0x26f   :  { %v2205_v11 = vpop.f32.mrb[3].mxu0  ;;  %v2212_v12 = vpop.f32.mrb[3].mxu1 }
 0x270   :  { %v2389_v12 = vpack.c.bf16 %v1733_v8, %v1732_v7 }
 0x276   :  { %v544_v13 = vpop.f32.mrb[4].mxu0  ;;  %v620_v14 = vpop.f32.mrb[4].mxu1 }
 0x277   :  { %v2219_v15 = vpop.f32.mrb[5].mxu0  ;;  %v2226_v16 = vpop.f32.mrb[5].mxu1  ;;  %2270 = vmatpush3.xpose.msk.msra.mxu0 %vm1088_vm3, %v544_v13  ;;  %2275 = vmatpush3.xpose.msk.msra.mxu1 %vm1088_vm3, %v620_v14 }
 0x278   :  { %2279 = vmatprep.subr.mxu0 %v2577_v22  ;;  %2284 = vmatprep.subr.mxu1 %v2577_v22 }
 0x27a   :  { %2272 = vmatmul.mubr.msk.f32.vlgmr.msra.gmra.mrb[12].mxu0 %vm1088_vm3, %v229_v5  ;;  %2277 = vmatmul.mubr.msk.f32.vlgmr.msra.gmra.mrb[12].mxu1 %vm1088_vm3, %v305_v6 }
 0x27b   :  { %2281 = vmatprep.mubr.msk.f32.mxu0 %vm2576_vm2, %v2577_v22  ;;  %2286 = vmatprep.mubr.msk.f32.mxu1 %vm2576_vm2, %v2577_v22 }
 0x27e   :  { %v696_v17 = vpop.f32.mrb[6].mxu0  ;;  %v772_v18 = vpop.f32.mrb[6].mxu1 }
 0x27f   :  { %v2233_v20 = vpop.f32.mrb[7].mxu0  ;;  %v2240_v21 = vpop.f32.mrb[7].mxu1  ;;  %2280 = vmatpush3.xpose.msk.msra.mxu0 %vm1088_vm3, %v696_v17  ;;  %2285 = vmatpush3.xpose.msk.msra.mxu1 %vm1088_vm3, %v772_v18  ;;  %v1736_v17 = vld [vmem:[#allocation10 + $0x30] sm:$0xff]  ;;  %v1737_v18 = vld [vmem:[#allocation10 + $0x38] sm:$0xff] }
 0x280   :  { %2289 = vmatprep.subr.mxu0 %v2577_v22  ;;  %2294 = vmatprep.subr.mxu1 %v2577_v22  ;;  %v1734_v20 = vld [vmem:[#allocation10 + $0x20] sm:$0xff]  ;;  %v1735_v21 = vld [vmem:[#allocation10 + $0x28] sm:$0xff] }
 0x282   :  { %2282 = vmatmul.mubr.msk.f32.vlgmr.msra.gmra.mrb[14].mxu0 %vm1088_vm3, %v384_v9  ;;  %2287 = vmatmul.mubr.msk.f32.vlgmr.msra.gmra.mrb[14].mxu1 %vm1088_vm3, %v460_v10  ;;  %v1730_v9 = vld [vmem:[#allocation10] sm:$0xff]  ;;  %v1731_v10 = vld [vmem:[#allocation10 + $0x8] sm:$0xff] }
 0x283   :  { %2291 = vmatprep.mubr.msk.f32.mxu0 %vm2576_vm2, %v2577_v22  ;;  %2296 = vmatprep.mubr.msk.f32.mxu1 %vm2576_vm2, %v2577_v22  ;;  %v2386_v15 = vpack.c.bf16 %v1731_v10, %v1730_v9 }
 0x286   :  { %v856_v23 = vpop.f32.mrb[8].mxu0  ;;  %v932_v24 = vpop.f32.mrb[8].mxu1 }
 0x287   :  { %v2247_v25 = vpop.f32.mrb[9].mxu0  ;;  %v2254_v26 = vpop.f32.mrb[9].mxu1  ;;  %2290 = vmatpush3.msra.mxu0 %v856_v23  ;;  %2295 = vmatpush3.msra.mxu1 %v932_v24  ;;  %v2395_v23 = vpack.c.bf16 %v1737_v18, %v1736_v17  ;;  %v2392_v24 = vpack.c.bf16 %v1735_v21, %v1734_v20 }
 0x288   :  { %2299 = vmatprep.subr.mxu0 %v2577_v22  ;;  %2304 = vmatprep.subr.mxu1 %v2577_v22 }
 0x28e   :  { %v2829_v27 = vpop.f32.mrb[10].mxu0  ;;  %v1084_v28 = vpop.f32.mrb[10].mxu1 }
 0x28f   :  { %v2261_v29 = vpop.f32.mrb[11].mxu0  ;;  %v2268_v30 = vpop.f32.mrb[11].mxu1 }
 0x34d   :  { %v1161_v31 = vpop.f32.mrb[12].mxu0  ;;  %v1237_v32 = vpop.f32.mrb[12].mxu1 }
 0x34e   :  { %v2273_v33 = vpop.f32.mrb[13].mxu0  ;;  %v2278_v34 = vpop.f32.mrb[13].mxu1  ;;  %v1397_v35 = vsel %vm1393_vm4, %v1237_v32, -inf  ;;  %v1394_v36 = vsel %vm1393_vm4, %v1161_v31, -inf }
 0x34f   :  { %1398 = vmax.xlane.f32.xlu1 %v1397_v35  ;;  %1395 = vmax.xlane.f32.xlu0 %v1394_v36 }
 0x355   :  { %v1313_v37 = vpop.f32.mrb[14].mxu0  ;;  %v1389_v38 = vpop.f32.mrb[14].mxu1 }
 0x356   :  { %v2283_v39 = vpop.f32.mrb[15].mxu0  ;;  %v2288_v40 = vpop.f32.mrb[15].mxu1  ;;  %v1403_v41 = vsel %vm1393_vm4, %v1389_v38, -inf  ;;  %v1400_v42 = vsel %vm1393_vm4, %v1313_v37, -inf }
 0x357   :  { %1404 = vmax.xlane.f32.xlu1 %v1403_v41  ;;  %1401 = vmax.xlane.f32.xlu0 %v1400_v42 }
 0x3dc   :  { %v1399_v43 = vpop.xlane.xlu1 %1398  ;;  %v1396_v44 = vpop.xlane.xlu0 %1395 }
 0x3dd   :  { %v1407_v45 = vsub.f32 %v1237_v32, %v1399_v43  ;;  %v1406_v46 = vsub.f32 %v1161_v31, %v1396_v44 }
 0x3df   :  { %v1412_v47 = vmul.f32 1.442695, %v1407_v45  ;;  %v1410_v48 = vmul.f32 1.442695, %v1406_v46 }
 0x3e1   :  { %2412 = vpow2.f32 %v1412_v47 }
 0x3e2   :  { %2414 = vpow2.f32 %v1410_v48 }
 0x3e4   :  { %v1405_v49 = vpop.xlane.xlu1 %1404  ;;  %v1402_v50 = vpop.xlane.xlu0 %1401 }
 0x3e5   :  { %v1409_v51 = vsub.f32 %v1389_v38, %v1405_v49  ;;  %v1408_v52 = vsub.f32 %v1313_v37, %v1402_v50  ;;  %v2120_v37 = vld [vmem:[%s2895_s7] ss:$0 sm:$0xff]  ;;  %s2538_s7 = scalar_lea.vmem %s2053_s25, 256 }
 0x3e6   :  { %p2539_p12 = scmp.ne.s32.totalorder %s2053_s25, %s2538_s7  ;;  %p2544_p0 = scmp.lt.s32.totalorder %s2538_s7, %s2538_s7 }
 0x3e7   :  { %v1416_v53 = vmul.f32 1.442695, %v1409_v51  ;;  %v1414_v54 = vmul.f32 1.442695, %v1408_v52 }
 0x3e8   :  { %p2545_p1 = por %p2544_p0, %p2543_p13 }
 0x3e9   :  { %2416 = vpow2.f32 %v1416_v53 }
 0x3ea   :  { %2418 = vpow2.f32 %v1414_v54  ;;  %p2546_p2 = pnand %p2545_p1, %p2539_p12 }
 0x3eb   :  { %v2413_v55 = vpop.eup %2412 }
 0x3ec   :  { %v2415_v56 = vpop.eup %2414  ;;  %v1421_v57 = vsel %vm1393_vm4, %v2413_v55, 0.0 }
 0x3ed   :  { %1422 = vadd.xlane.f32.xlu1 %v1421_v57  ;;  %v1418_v58 = vsel %vm1393_vm4, %v2415_v56, 0.0 }
 0x3ee   :  { %1419 = vadd.xlane.f32.xlu0 %v1418_v58 }
 0x3f3   :  { %v2417_v59 = vpop.eup %2416 }
 0x3f4   :  { %v2419_v60 = vpop.eup %2418  ;;  %v1427_v61 = vsel %vm1393_vm4, %v2417_v59, 0.0 }
 0x3f5   :  { %1428 = vadd.xlane.f32.xlu1 %v1427_v61  ;;  %v1424_v62 = vsel %vm1393_vm4, %v2419_v60, 0.0 }
 0x3f6   :  { %1425 = vadd.xlane.f32.xlu0 %v1424_v62 }
 0x47a   :  { %v1423_v63 = vpop.xlane.xlu1 %1422 }
 0x47b   :  { %2420 = vrcp.f32 %v1423_v63  ;;  %v1420_v0 = vpop.xlane.xlu0 %1419 }
 0x47c   :  { %2422 = vrcp.f32 %v1420_v0 }
 0x482   :  { %v1429_v1 = vpop.xlane.xlu1 %1428 }
 0x483   :  { %2424 = vrcp.f32 %v1429_v1  ;;  %v1426_v2 = vpop.xlane.xlu0 %1425 }
 0x484   :  { %2426 = vrcp.f32 %v1426_v2 }
 0x485   :  { %v2421_v3 = vpop.eup %2420 }
 0x486   :  { %v2423_v4 = vpop.eup %2422  ;;  %v1435_v5 = vmul.f32 %v2421_v3, %v2413_v55 }
 0x487   :  { %v1434_v6 = vmul.f32 %v2423_v4, %v2415_v56 }
 0x488   :  { %2297 = vmatmul.mubr.msk.f32.vlgmr.msra.gmra.mrb[16].mxu1 %vm1393_vm4, %v1435_v5 }
 0x489   :  { %2292 = vmatmul.mubr.msk.f32.vlgmr.msra.gmra.mrb[16].mxu0 %vm1393_vm4, %v1434_v6  ;;  %2305 = vmatpush3.msra.mxu1 %v1084_v28 }
 0x48a   :  { %2300 = vmatpush3.msra.mxu0 %v2829_v27  ;;  %2301 = vmatprep.mubr.msk.f32.mxu0 %vm2576_vm2, %v2577_v22 }
 0x48b   :  { %2306 = vmatprep.mubr.msk.f32.mxu1 %vm2576_vm2, %v2577_v22  ;;  %2385 = vmatprep.subr.bf16.mxu0 %v2575_v19 }
 0x48c   :  { %2388 = vmatprep.subr.bf16.mxu1 %v2575_v19 }
 0x48d   :  { %v2425_v11 = vpop.eup %2424 }
 0x48e   :  { %v2427_v13 = vpop.eup %2426  ;;  %v1437_v14 = vmul.f32 %v2425_v11, %v2417_v59 }
 0x48f   :  { %v1436_v16 = vmul.f32 %v2427_v13, %v2419_v60 }
 0x490   :  { %2307 = vmatmul.mubr.msk.f32.vlgmr.msra.gmra.mrb[18].mxu1 %vm1393_vm4, %v1437_v14 }
 0x491   :  { %2302 = vmatmul.mubr.msk.f32.vlgmr.msra.gmra.mrb[18].mxu0 %vm1393_vm4, %v1436_v16  ;;  %2390 = vmatpush3.bf16.msra.mxu1 %v2389_v12 }
 0x492   :  { %2387 = vmatpush3.bf16.msra.mxu0 %v2386_v15  ;;  %2313 = vmatprep.mubr.msk.f32.mxu0 %vm2576_vm2, %v2577_v22 }
 0x493   :  { %2320 = vmatprep.mubr.msk.f32.mxu1 %vm2576_vm2, %v2577_v22  ;;  %2391 = vmatprep.subr.bf16.mxu0 %v2575_v19 }
 0x494   :  { %2394 = vmatprep.subr.bf16.mxu1 %v2575_v19 }
 0x55b   :  { %v1580_v25 = vpop.f32.mrb[16].mxu1 }
 0x55c   :  { %v1507_v26 = vpop.f32.mrb[16].mxu0  ;;  %v2298_v27 = vpop.f32.mrb[17].mxu1  ;;  %2321 = vmatmul.mubr.msk.f32.vlgmr.msra.gmra.mrb[20].mxu1 %vm1088_vm3, %v1580_v25 }
 0x55d   :  { %v2293_v28 = vpop.f32.mrb[17].mxu0  ;;  %2314 = vmatmul.mubr.msk.f32.vlgmr.msra.gmra.mrb[20].mxu0 %vm1088_vm3, %v1507_v26  ;;  %2396 = vmatpush3.bf16.msra.mxu1 %v2395_v23 }
 0x55e   :  { %2393 = vmatpush3.bf16.msra.mxu0 %v2392_v24  ;;  %2327 = vmatprep.mubr.msk.f32.mxu0 %vm2576_vm2, %v2577_v22 }
 0x55f   :  { %2334 = vmatprep.mubr.msk.f32.mxu1 %vm2576_vm2, %v2577_v22 }
 0x563   :  { %v1726_v19 = vpop.f32.mrb[18].mxu1 }
 0x564   :  { %v1653_v29 = vpop.f32.mrb[18].mxu0  ;;  %v2308_v30 = vpop.f32.mrb[19].mxu1  ;;  %2335 = vmatmul.mubr.msk.f32.vlgmr.msra.gmra.mrb[22].mxu1 %vm1088_vm3, %v1726_v19 }
 0x565   :  { %v2303_v31 = vpop.f32.mrb[19].mxu0  ;;  %2328 = vmatmul.mubr.msk.f32.vlgmr.msra.gmra.mrb[22].mxu0 %vm1088_vm3, %v1653_v29 }
 0x62f   :  { %v1880_v32 = vpop.f32.mrb[20].mxu1 }
 0x630   :  { %v1807_v33 = vpop.f32.mrb[20].mxu0  ;;  %v2031_v34 = vsel %vm100_vm0, %v1880_v32, 0.0  ;;  %v2322_v35 = vpop.f32.mrb[21].mxu1 }
 0x631   :  { %v2030_v36 = vsel %vm100_vm0, %v1807_v33, 0.0  ;;  %v2315_v22 = vpop.f32.mrb[21].mxu0 }
 0x632   :  { %v2032_v38 = vadd.f32 %v2031_v34, %v2030_v36 }
 0x634   :  { %v2043_v39 = vadd.f32 %v2120_v37, %v2032_v38 }
 0x636   :  { %2045 = vst.msk [vmem:[#allocation11] sm:$0xff] %vm100_vm0, %v2043_v39 }
 0x637   :  { %v2026_v40 = vpop.f32.mrb[22].mxu1 }
 0x638   :  { %v1953_v41 = vpop.f32.mrb[22].mxu0  ;;  %v2034_v42 = vsel %vm100_vm0, %v2026_v40, 0.0  ;;  %v2336_v43 = vpop.f32.mrb[23].mxu1 }
 0x639   :  { %v2033_v44 = vsel %vm100_vm0, %v1953_v41, 0.0  ;;  %v2329_v45 = vpop.f32.mrb[23].mxu0 }
 0x63a   :  { %v2035_v46 = vadd.f32 %v2034_v42, %v2033_v44 }
 0x63c   :  { %v2044_v47 = vadd.f32 %v2120_v37, %v2035_v46 }
 0x63e   :  { %2046 = vst.msk [vmem:[#allocation11 + $0x8] sm:$0xff] %vm100_vm0, %v2044_v47 }
 0x63f   :  { %2549 = shalt.err (!%p2546_p2)
}
 0x640   :  { %s2550_s29 = scalar_lea.hbm %s2896_s8, 256 }
 0x641   :  { %p2551_p3 = scmp.ne.s32.totalorder %s2896_s8, %s2550_s29  ;;  %p2554_p4 = scmp.lt.u32.totalorder %s2550_s29, %s2896_s8 }
 0x643   :  { %p2556_p5 = pnand %p2554_p4, %p2551_p3 }
 0x645   :  { %2559 = shalt.err (!%p2556_p5)
}
 0x646   :  { %2058 = dma.vmem_to_hbm [thread:$0]  %s2053_s25, 256, %s2896_s8, [#allocation4], %s2570_s17, %s2570_s17, %s2571_s18  }
 0x647   :  { %2566 = dma.done.wait [#allocation4], 256  }
 0x648   :  { %2567 = vsyncadd [#allocation4], 4294967040 }
 0x649   :  { %2062 = vsyncpa [#allocation3], 1 }
 0x64a   :  { %2063 = vsyncpa [#allocation6], 1 }
 0x64b   :  { %2064 = vsyncpa [#allocation9], 1 }
 0x64c   :  { %2065 = vsyncpa [#allocation4], 1 }

</bundles_post_ra>
